<compile_context>
chip_gen: v7x
topology: tpu7x:2x2x1
jax: 0.10.0
libtpu: 0.0.40
codegen_flags: <defaults>
</compile_context>

<pallas_src>
import math
from functools import partial

import jax
import jax.numpy as jnp
from jax import lax
from jax.experimental import pallas as pl
from jax.experimental.pallas import tpu as pltpu


# ----------------------------------------------------------------------------
# Host-side helper: seasonal operator  S = I - A  (series_decomp as a matmul)
# ----------------------------------------------------------------------------
def _seasonal_matrix(L, ma):
    """A[i, j] = (1/ma) * #taps of the edge-replicated AvgPool1d window at i
    that land on position j; series_decomp seasonal part is (I - A) @ x.
    Matches Autoformer's odd moving_avg kernel (p = (ma-1)//2 pad each side)."""
    p = (ma - 1) // 2
    taps = jnp.clip(jnp.arange(L)[:, None] - p + jnp.arange(ma)[None, :], 0, L - 1)
    A = jnp.zeros((L, L), jnp.float32).at[jnp.arange(L)[:, None], taps].add(1.0 / ma)
    return jnp.eye(L, dtype=jnp.float32) - A


# ----------------------------------------------------------------------------
# Pallas kernel: one (batch, layer) grid step; activation carried in VMEM
# ----------------------------------------------------------------------------
def encoder_layer_kernel(x_ref, sm_ref,
                         wq_ref, bq_ref, wk_ref, bk_ref, wv_ref, bv_ref,
                         wo_ref, bo_ref, w1_ref, w2_ref,
                         g_ref, b_ref, o_ref, x_acc,
                         *, n_heads, mm_dtype):
    l_idx = pl.program_id(1)

    # First layer for this batch element: load activation into the
    # layer-persistent VMEM accumulator.
    @pl.when(l_idx == 0)
    def _():
        x_acc[...] = x_ref[0].astype(jnp.float32)

    x = x_acc[...]                                   # (L, D) f32, resident
    L, D = x.shape
    dk = D // n_heads
    scale = 1.0 / math.sqrt(dk)

    def mm(a, b):                                    # MXU matmul, f32 accum
        return jnp.dot(a, b, preferred_element_type=jnp.float32)

    S = sm_ref[...]                                  # (L, L), already mm_dtype
    xb = x.astype(mm_dtype)                          # hoisted cast (once/layer)

    # --- full-width Q/K/V projections (lane-saturating MXU matmuls) --------
    # 1/sqrt(dk) folded into Q: scales an (L, D) tensor instead of (L, L).
    q = (mm(xb, wq_ref[0]) + bq_ref[0]) * scale
    k = mm(xb, wk_ref[0]) + bk_ref[0]
    v = mm(xb, wv_ref[0]) + bv_ref[0]
    qb = q.astype(mm_dtype)
    kb = k.astype(mm_dtype)
    vb = v.astype(mm_dtype)

    # --- per-head full attention; head concat folded into Wo (accumulate) --
    # TODO(synk): for production L >= ~1024, block the KV axis flash-style
    # (online softmax) instead of materializing full (L, L) scores per head.
    attn = None
    for h in range(n_heads):                         # static unrolled heads
        sl = slice(h * dk, (h + 1) * dk)
        # Contract on the feature axis directly (no kh.T materialization).
        s = lax.dot_general(qb[:, sl], kb[:, sl],
                            dimension_numbers=(((1,), (1,)), ((), ())),
                            preferred_element_type=jnp.float32)     # (L, L)
        s = s - jnp.max(s, axis=-1, keepdims=True)
        p = jnp.exp(s)
        p = p * pl.reciprocal(jnp.sum(p, axis=-1, keepdims=True), approx=True)
        oh = mm(p.astype(mm_dtype), vb[:, sl])                      # (L, dk)
        c = mm(oh.astype(mm_dtype), wo_ref[0, sl, :])               # (L, D)
        attn = c if attn is None else attn + c
    new_x = attn + bo_ref[0]

    # --- residual + series_decomp #1 (dropout == identity in eval) ---------
    # TODO(synk): for production L, replace the dense (L,L) seasonal matmul
    # with the banded moving-average (pltpu.roll shifted adds + edge fix-up)
    # so the decomp comes off the MXU critical path.
    x1 = x + new_x
    s1 = mm(S, x1.astype(mm_dtype))                  # (I - A) @ x1, f32 out

    # --- FFN: 1x1 conv -> relu -> 1x1 conv (bias-free) ----------------------
    y = jnp.maximum(mm(s1.astype(mm_dtype), w1_ref[0]), 0.0)
    y = mm(y.astype(mm_dtype), w2_ref[0])

    # --- residual + series_decomp #2 ----------------------------------------
    x2 = s1 + y
    x_out = mm(S, x2.astype(mm_dtype))
    x_acc[...] = x_out

    # --- last layer: fused my_Layernorm + output store -----------------------
    @pl.when(l_idx == pl.num_programs(1) - 1)
    def _():
        mu = jnp.mean(x_out, axis=-1, keepdims=True)
        var = jnp.mean((x_out - mu) ** 2, axis=-1, keepdims=True)
        xh = (x_out - mu) * jax.lax.rsqrt(var + 1e-5)
        xh = xh * g_ref[...] + b_ref[...]
        bias = jnp.mean(xh, axis=0, keepdims=True)   # seq-mean (my_Layernorm)
        o_ref[0] = (xh - bias).astype(o_ref.dtype)


# ----------------------------------------------------------------------------
# Wrapper: one pallas_call for the whole Encoder forward
# ----------------------------------------------------------------------------
def encoder_forward(x, stacked, norm_params, *, n_heads, ma,
                    mm_dtype=jnp.float32):
    B, L, D = x.shape
    n_layers = stacked["wq"].shape[0]
    d_ff = stacked["w1"].shape[-1]

    # Matmul weights and the seasonal operator are shipped from HBM already in
    # mm_dtype (bf16 in production: half the weight DMA bytes + VMEM, no
    # in-kernel weight casts).  Biases stay f32 (added to f32 accumulators).
    S = _seasonal_matrix(L, ma).astype(mm_dtype)
    mm_keys = ("wq", "wk", "wv", "wo", "w1", "w2")
    w = {k: (v.astype(mm_dtype) if k in mm_keys else v)
         for k, v in stacked.items()}

    def per_layer(shape):
        # One layer's block, walking the stacked-layer axis with grid axis 1
        # (double-buffered by default -> next layer's weights prefetched).
        return pl.BlockSpec((1,) + shape, lambda b, l: (l,) + (0,) * len(shape))

    def invariant(shape):
        # Grid-invariant inputs (seasonal op, norm gamma/beta): constant block
        # index, fetched once.  At production L the (L, L) seasonal operator
        # could additionally be single-buffered (pipeline_mode=pl.Buffered(1))
        # to halve its VMEM footprint; left at the default here.
        return pl.BlockSpec(shape, lambda b, l: (0,) * len(shape))

    kern = partial(encoder_layer_kernel, n_heads=n_heads, mm_dtype=mm_dtype)
    return pl.pallas_call(
        kern,
        out_shape=jax.ShapeDtypeStruct((B, L, D), x.dtype),
        grid=(B, n_layers),
        in_specs=[
            pl.BlockSpec((1, L, D), lambda b, l: (b, 0, 0)),     # x
            invariant((L, L)),                                   # seasonal op
            per_layer((D, D)), per_layer((1, D)),                # Wq, bq
            per_layer((D, D)), per_layer((1, D)),                # Wk, bk
            per_layer((D, D)), per_layer((1, D)),                # Wv, bv
            per_layer((D, D)), per_layer((1, D)),                # Wo, bo
            per_layer((D, d_ff)),                                # conv1 (1x1)
            per_layer((d_ff, D)),                                # conv2 (1x1)
            invariant((1, D)), invariant((1, D)),                # gamma, beta
        ],
        out_specs=pl.BlockSpec((1, L, D), lambda b, l: (b, 0, 0)),
        scratch_shapes=[pltpu.VMEM((L, D), jnp.float32)],        # layer-carried x
        compiler_params=pltpu.CompilerParams(
            # B on the parallel axis -> both v7x TensorCores get work; the
            # layer axis is sequential (activation carried in scratch).
            dimension_semantics=("parallel", "arbitrary"),
            # Per-step working set is now one layer's (double-buffered)
            # weights + S + activations: comfortably under 32 MiB even at
            # production D=512 / d_ff=2048 bf16 (fits v7x's 64 MiB VMEM).
            vmem_limit_bytes=32 * 1024 * 1024,
        ),
    )(x, S,
      w["wq"], w["bq"], w["wk"], w["bk"], w["wv"], w["bv"],
      w["wo"], w["bo"], w["w1"], w["w2"],
      norm_params["gamma"], norm_params["beta"])


# ----------------------------------------------------------------------------
# Pure-JAX reference (independent implementation, for correctness check)
# ----------------------------------------------------------------------------
def _ref_moving_avg(x, ma):
    p = (ma - 1) // 2
    L = x.shape[1]
    xp = jnp.concatenate(
        [jnp.repeat(x[:, :1, :], p, axis=1), x, jnp.repeat(x[:, -1:, :], p, axis=1)],
        axis=1)
    return sum(xp[:, i:i + L, :] for i in range(ma)) / float(ma)


def _ref_layer(x, prm, n_heads, ma):
    B, L, D = x.shape
    dk = D // n_heads
    q = (x @ prm["wq"] + prm["bq"][0]).reshape(B, L, n_heads, dk)
    k = (x @ prm["wk"] + prm["bk"][0]).reshape(B, L, n_heads, dk)
    v = (x @ prm["wv"] + prm["bv"][0]).reshape(B, L, n_heads, dk)
    s = jnp.einsum("blhe,bshe->bhls", q, k) / math.sqrt(dk)
    a = jax.nn.softmax(s, axis=-1)
    o = jnp.einsum("bhls,bshd->blhd", a, v).reshape(B, L, D)
    x1 = x + (o @ prm["wo"] + prm["bo"][0])
    s1 = x1 - _ref_moving_avg(x1, ma)
    y = jax.nn.relu(s1 @ prm["w1"]) @ prm["w2"]
    x2 = s1 + y
    return x2 - _ref_moving_avg(x2, ma)


def _ref_encoder(x, layer_params, norm_params, n_heads, ma):
    for prm in layer_params:
        x = _ref_layer(x, prm, n_heads, ma)
    mu = jnp.mean(x, axis=-1, keepdims=True)
    var = jnp.mean((x - mu) ** 2, axis=-1, keepdims=True)
    xh = (x - mu) * jax.lax.rsqrt(var + 1e-5)
    xh = xh * norm_params["gamma"][0] + norm_params["beta"][0]
    return xh - jnp.mean(xh, axis=1, keepdims=True)


# ----------------------------------------------------------------------------
# Deterministic parameter init (synthetic; PyTorch-Linear-like uniform bounds)
# ----------------------------------------------------------------------------
def _init_layer(key, d_model, d_ff):
    ks = jax.random.split(key, 10)
    u = lambda k, shape, fan_in: jax.random.uniform(
        k, shape, jnp.float32, -1.0 / math.sqrt(fan_in), 1.0 / math.sqrt(fan_in))
    return {
        "wq": u(ks[0], (d_model, d_model), d_model), "bq": u(ks[1], (1, d_model), d_model),
        "wk": u(ks[2], (d_model, d_model), d_model), "bk": u(ks[3], (1, d_model), d_model),
        "wv": u(ks[4], (d_model, d_model), d_model), "bv": u(ks[5], (1, d_model), d_model),
        "wo": u(ks[6], (d_model, d_model), d_model), "bo": u(ks[7], (1, d_model), d_model),
        "w1": u(ks[8], (d_model, d_ff), d_model),    # Conv1d(d_model,d_ff,1,bias=False)^T
        "w2": u(ks[9], (d_ff, d_model), d_ff),       # Conv1d(d_ff,d_model,1,bias=False)^T
    }


def _stack_layers(layer_params):
    keys = layer_params[0].keys()
    return {k: jnp.stack([p[k] for p in layer_params], axis=0) for k in keys}


if __name__ == "__main__":
    B, L, D = 2, 8, 32          # batch, seq_len, d_model
    H, D_FF, MA = 2, 64, 5      # n_heads, d_ff, moving_avg kernel
    N_LAYERS = 2

    root = jax.random.PRNGKey(0)
    kx, *kl = jax.random.split(root, 1 + N_LAYERS)
    x = jax.random.normal(kx, (B, L, D), jnp.float32)
    layer_params = [_init_layer(k, D, D_FF) for k in kl]
    stacked = _stack_layers(layer_params)
    norm_params = {"gamma": jnp.ones((1, D), jnp.float32),
                   "beta": jnp.zeros((1, D), jnp.float32)}

    # Demo runs f32 matmuls for a tight check; pass mm_dtype=jnp.bfloat16 for
    # production d_model/d_ff (roughly 2x MXU throughput, half the weight DMA
    # and resident weight VMEM).
    out = encoder_forward(x, stacked, norm_params, n_heads=H, ma=MA,
                          mm_dtype=jnp.float32)
    out = jax.block_until_ready(out)

    ref = _ref_encoder(x, layer_params, norm_params, H, MA)
    assert out.shape == (B, L, D)
    # Tolerance loosened slightly for the approx (EUP) softmax reciprocal.
    assert jnp.allclose(out, ref, atol=5e-3, rtol=5e-3), "mismatch vs JAX reference"

    print("KERNEL_OK")
</pallas_src>

<mosaic_0001>
module attributes {stable_mosaic.version = 11 : i64} {
  func.func @encoder_layer_kernel(%arg0: i32, %arg1: i32, %arg2: memref<1x8x32xf32, #tpu.memory_space<vmem>>, %arg3: memref<8x8xf32, #tpu.memory_space<vmem>>, %arg4: memref<1x32x32xf32, #tpu.memory_space<vmem>>, %arg5: memref<1x1x32xf32, #tpu.memory_space<vmem>>, %arg6: memref<1x32x32xf32, #tpu.memory_space<vmem>>, %arg7: memref<1x1x32xf32, #tpu.memory_space<vmem>>, %arg8: memref<1x32x32xf32, #tpu.memory_space<vmem>>, %arg9: memref<1x1x32xf32, #tpu.memory_space<vmem>>, %arg10: memref<1x32x32xf32, #tpu.memory_space<vmem>>, %arg11: memref<1x1x32xf32, #tpu.memory_space<vmem>>, %arg12: memref<1x32x64xf32, #tpu.memory_space<vmem>>, %arg13: memref<1x64x32xf32, #tpu.memory_space<vmem>>, %arg14: memref<1x32xf32, #tpu.memory_space<vmem>>, %arg15: memref<1x32xf32, #tpu.memory_space<vmem>>, %arg16: memref<1x8x32xf32, #tpu.memory_space<vmem>>, %arg17: memref<8x32xf32, #tpu.memory_space<vmem>>) attributes {dimension_semantics = [#tpu.dimension_semantics<parallel>, #tpu.dimension_semantics<arbitrary>], iteration_bounds = array<i64: 2, 2>, scalar_prefetch = 0 : i64, scratch_operands = 1 : i64, tpu.core_type = #tpu.core_type<tc>, window_params = [{transform_indices = @transform_0, window_bounds = array<i64: 1, 8, 32>}, {pipeline_mode = #tpu.pipeline_mode<synchronous>, transform_indices = @transform_1, window_bounds = array<i64: 8, 8>}, {transform_indices = @transform_2, window_bounds = array<i64: 1, 32, 32>}, {transform_indices = @transform_3, window_bounds = array<i64: 1, 1, 32>}, {transform_indices = @transform_4, window_bounds = array<i64: 1, 32, 32>}, {transform_indices = @transform_5, window_bounds = array<i64: 1, 1, 32>}, {transform_indices = @transform_6, window_bounds = array<i64: 1, 32, 32>}, {transform_indices = @transform_7, window_bounds = array<i64: 1, 1, 32>}, {transform_indices = @transform_8, window_bounds = array<i64: 1, 32, 32>}, {transform_indices = @transform_9, window_bounds = array<i64: 1, 1, 32>}, {transform_indices = @transform_10, window_bounds = array<i64: 1, 32, 64>}, {transform_indices = @transform_11, window_bounds = array<i64: 1, 64, 32>}, {pipeline_mode = #tpu.pipeline_mode<synchronous>, transform_indices = @transform_12, window_bounds = array<i64: 1, 32>}, {pipeline_mode = #tpu.pipeline_mode<synchronous>, transform_indices = @transform_13, window_bounds = array<i64: 1, 32>}, {transform_indices = @transform_14, window_bounds = array<i64: 1, 8, 32>}]} {
    %c0_i32 = arith.constant 0 : i32
    %0 = arith.cmpi eq, %arg1, %c0_i32 : i32
    %1 = arith.extui %0 : i1 to i32
    %c0_i32_0 = arith.constant 0 : i32
    %2 = arith.cmpi ne, %1, %c0_i32_0 : i32
    scf.if %2 {
      %c0_57 = arith.constant 0 : index
      %c0_58 = arith.constant 0 : index
      %c0_59 = arith.constant 0 : index
      %85 = vector.load %arg2[%c0_57, %c0_58, %c0_59] : memref<1x8x32xf32, #tpu.memory_space<vmem>>, vector<1x8x32xf32>
      %86 = vector.shape_cast %85 : vector<1x8x32xf32> to vector<8x32xf32>
      %c0_60 = arith.constant 0 : index
      %c0_61 = arith.constant 0 : index
      %87 = vector.load %arg17[%c0_60, %c0_61] : memref<8x32xf32, #tpu.memory_space<vmem>>, vector<8x32xf32>
      tpu.vector_store %arg17[%c0_60, %c0_61], %86 {strides = array<i32>} : memref<8x32xf32, #tpu.memory_space<vmem>>, vector<8x32xf32>,
    } else {
    }
    %c0 = arith.constant 0 : index
    %c0_1 = arith.constant 0 : index
    %3 = vector.load %arg17[%c0, %c0_1] : memref<8x32xf32, #tpu.memory_space<vmem>>, vector<8x32xf32>
    %c0_2 = arith.constant 0 : index
    %c0_3 = arith.constant 0 : index
    %4 = vector.load %arg3[%c0_2, %c0_3] : memref<8x8xf32, #tpu.memory_space<vmem>>, vector<8x8xf32>
    %c0_4 = arith.constant 0 : index
    %c0_5 = arith.constant 0 : index
    %c0_6 = arith.constant 0 : index
    %5 = vector.load %arg4[%c0_4, %c0_5, %c0_6] : memref<1x32x32xf32, #tpu.memory_space<vmem>>, vector<1x32x32xf32>
    %6 = vector.shape_cast %5 : vector<1x32x32xf32> to vector<32x32xf32>
    %cst = arith.constant dense<0.000000e+00> : vector<8x32xf32>
    %7 = tpu.matmul %3, %6, %cst {dimension_numbers = #tpu.dot_dimension_numbers<[1], [0], [0], [1], [0, 0, 1, 1], [], []>} : vector<8x32xf32>, vector<32x32xf32>, vector<8x32xf32> -> vector<8x32xf32>
    %c0_7 = arith.constant 0 : index
    %c0_8 = arith.constant 0 : index
    %c0_9 = arith.constant 0 : index
    %8 = vector.load %arg5[%c0_7, %c0_8, %c0_9] : memref<1x1x32xf32, #tpu.memory_space<vmem>>, vector<1x1x32xf32>
    %9 = vector.shape_cast %8 : vector<1x1x32xf32> to vector<1x32xf32>
    %10 = vector.broadcast %9 : vector<1x32xf32> to vector<8x32xf32>
    %11 = arith.addf %7, %10 : vector<8x32xf32>
    %cst_10 = arith.constant 2.500000e-01 : f32
    %12 = vector.broadcast %cst_10 : f32 to vector<8x32xf32>
    %13 = arith.mulf %11, %12 : vector<8x32xf32>
    %c0_11 = arith.constant 0 : index
    %c0_12 = arith.constant 0 : index
    %c0_13 = arith.constant 0 : index
    %14 = vector.load %arg6[%c0_11, %c0_12, %c0_13] : memref<1x32x32xf32, #tpu.memory_space<vmem>>, vector<1x32x32xf32>
    %15 = vector.shape_cast %14 : vector<1x32x32xf32> to vector<32x32xf32>
    %cst_14 = arith.constant dense<0.000000e+00> : vector<8x32xf32>
    %16 = tpu.matmul %3, %15, %cst_14 {dimension_numbers = #tpu.dot_dimension_numbers<[1], [0], [0], [1], [0, 0, 1, 1], [], []>} : vector<8x32xf32>, vector<32x32xf32>, vector<8x32xf32> -> vector<8x32xf32>
    %c0_15 = arith.constant 0 : index
    %c0_16 = arith.constant 0 : index
    %c0_17 = arith.constant 0 : index
    %17 = vector.load %arg7[%c0_15, %c0_16, %c0_17] : memref<1x1x32xf32, #tpu.memory_space<vmem>>, vector<1x1x32xf32>
    %18 = vector.shape_cast %17 : vector<1x1x32xf32> to vector<1x32xf32>
    %19 = vector.broadcast %18 : vector<1x32xf32> to vector<8x32xf32>
    %20 = arith.addf %16, %19 : vector<8x32xf32>
    %c0_18 = arith.constant 0 : index
    %c0_19 = arith.constant 0 : index
    %c0_20 = arith.constant 0 : index
    %21 = vector.load %arg8[%c0_18, %c0_19, %c0_20] : memref<1x32x32xf32, #tpu.memory_space<vmem>>, vector<1x32x32xf32>
    %22 = vector.shape_cast %21 : vector<1x32x32xf32> to vector<32x32xf32>
    %cst_21 = arith.constant dense<0.000000e+00> : vector<8x32xf32>
    %23 = tpu.matmul %3, %22, %cst_21 {dimension_numbers = #tpu.dot_dimension_numbers<[1], [0], [0], [1], [0, 0, 1, 1], [], []>} : vector<8x32xf32>, vector<32x32xf32>, vector<8x32xf32> -> vector<8x32xf32>
    %c0_22 = arith.constant 0 : index
    %c0_23 = arith.constant 0 : index
    %c0_24 = arith.constant 0 : index
    %24 = vector.load %arg9[%c0_22, %c0_23, %c0_24] : memref<1x1x32xf32, #tpu.memory_space<vmem>>, vector<1x1x32xf32>
    %25 = vector.shape_cast %24 : vector<1x1x32xf32> to vector<1x32xf32>
    %26 = vector.broadcast %25 : vector<1x32xf32> to vector<8x32xf32>
    %27 = arith.addf %23, %26 : vector<8x32xf32>
    %28 = vector.extract_strided_slice %13 {offsets = [0, 0], sizes = [8, 16], strides = [1, 1]} : vector<8x32xf32> to vector<8x16xf32>
    %29 = vector.extract_strided_slice %20 {offsets = [0, 0], sizes = [8, 16], strides = [1, 1]} : vector<8x32xf32> to vector<8x16xf32>
    %cst_25 = arith.constant dense<0.000000e+00> : vector<8x8xf32>
    %30 = tpu.matmul %28, %29, %cst_25 {dimension_numbers = #tpu.dot_dimension_numbers<[1], [1], [0], [0], [0, 0, 1, 0], [], []>} : vector<8x16xf32>, vector<8x16xf32>, vector<8x8xf32> -> vector<8x8xf32>
    %cst_26 = arith.constant dense<0xFF800000> : vector<8xf32>
    %31 = vector.multi_reduction <maximumf>, %30, %cst_26 [1] : vector<8x8xf32> to vector<8xf32>
    %32 = vector.shape_cast %31 : vector<8xf32> to vector<8x1xf32>
    %33 = vector.broadcast %32 : vector<8x1xf32> to vector<8x8xf32>
    %34 = arith.subf %30, %33 : vector<8x8xf32>
    %35 = math.exp %34 : vector<8x8xf32>
    %cst_27 = arith.constant dense<0.000000e+00> : vector<8xf32>
    %36 = vector.multi_reduction <add>, %35, %cst_27 [1] : vector<8x8xf32> to vector<8xf32>
    %37 = vector.shape_cast %36 : vector<8xf32> to vector<8x1xf32>
    %38 = tpu.reciprocal %37 {approx = true} : vector<8x1xf32> -> vector<8x1xf32>
    %39 = vector.broadcast %38 : vector<8x1xf32> to vector<8x8xf32>
    %40 = arith.mulf %35, %39 : vector<8x8xf32>
    %41 = vector.extract_strided_slice %27 {offsets = [0, 0], sizes = [8, 16], strides = [1, 1]} : vector<8x32xf32> to vector<8x16xf32>
    %cst_28 = arith.constant dense<0.000000e+00> : vector<8x16xf32>
    %42 = tpu.matmul %40, %41, %cst_28 {dimension_numbers = #tpu.dot_dimension_numbers<[1], [0], [0], [1], [0, 0, 1, 1], [], []>} : vector<8x8xf32>, vector<8x16xf32>, vector<8x16xf32> -> vector<8x16xf32>
    %c0_29 = arith.constant 0 : index
    %c0_30 = arith.constant 0 : index
    %c0_31 = arith.constant 0 : index
    %43 = vector.load %arg10[%c0_29, %c0_30, %c0_31] : memref<1x32x32xf32, #tpu.memory_space<vmem>>, vector<1x16x32xf32>
    %44 = vector.shape_cast %43 : vector<1x16x32xf32> to vector<16x32xf32>
    %cst_32 = arith.constant dense<0.000000e+00> : vector<8x32xf32>
    %45 = tpu.matmul %42, %44, %cst_32 {dimension_numbers = #tpu.dot_dimension_numbers<[1], [0], [0], [1], [0, 0, 1, 1], [], []>} : vector<8x16xf32>, vector<16x32xf32>, vector<8x32xf32> -> vector<8x32xf32>
    %46 = vector.extract_strided_slice %13 {offsets = [0, 16], sizes = [8, 16], strides = [1, 1]} : vector<8x32xf32> to vector<8x16xf32>
    %47 = vector.extract_strided_slice %20 {offsets = [0, 16], sizes = [8, 16], strides = [1, 1]} : vector<8x32xf32> to vector<8x16xf32>
    %cst_33 = arith.constant dense<0.000000e+00> : vector<8x8xf32>
    %48 = tpu.matmul %46, %47, %cst_33 {dimension_numbers = #tpu.dot_dimension_numbers<[1], [1], [0], [0], [0, 0, 1, 0], [], []>} : vector<8x16xf32>, vector<8x16xf32>, vector<8x8xf32> -> vector<8x8xf32>
    %cst_34 = arith.constant dense<0xFF800000> : vector<8xf32>
    %49 = vector.multi_reduction <maximumf>, %48, %cst_34 [1] : vector<8x8xf32> to vector<8xf32>
    %50 = vector.shape_cast %49 : vector<8xf32> to vector<8x1xf32>
    %51 = vector.broadcast %50 : vector<8x1xf32> to vector<8x8xf32>
    %52 = arith.subf %48, %51 : vector<8x8xf32>
    %53 = math.exp %52 : vector<8x8xf32>
    %cst_35 = arith.constant dense<0.000000e+00> : vector<8xf32>
    %54 = vector.multi_reduction <add>, %53, %cst_35 [1] : vector<8x8xf32> to vector<8xf32>
    %55 = vector.shape_cast %54 : vector<8xf32> to vector<8x1xf32>
    %56 = tpu.reciprocal %55 {approx = true} : vector<8x1xf32> -> vector<8x1xf32>
    %57 = vector.broadcast %56 : vector<8x1xf32> to vector<8x8xf32>
    %58 = arith.mulf %53, %57 : vector<8x8xf32>
    %59 = vector.extract_strided_slice %27 {offsets = [0, 16], sizes = [8, 16], strides = [1, 1]} : vector<8x32xf32> to vector<8x16xf32>
    %cst_36 = arith.constant dense<0.000000e+00> : vector<8x16xf32>
    %60 = tpu.matmul %58, %59, %cst_36 {dimension_numbers = #tpu.dot_dimension_numbers<[1], [0], [0], [1], [0, 0, 1, 1], [], []>} : vector<8x8xf32>, vector<8x16xf32>, vector<8x16xf32> -> vector<8x16xf32>
    %c0_37 = arith.constant 0 : index
    %c16 = arith.constant 16 : index
    %c0_38 = arith.constant 0 : index
    %61 = vector.load %arg10[%c0_37, %c16, %c0_38] : memref<1x32x32xf32, #tpu.memory_space<vmem>>, vector<1x16x32xf32>
    %62 = vector.shape_cast %61 : vector<1x16x32xf32> to vector<16x32xf32>
    %cst_39 = arith.constant dense<0.000000e+00> : vector<8x32xf32>
    %63 = tpu.matmul %60, %62, %cst_39 {dimension_numbers = #tpu.dot_dimension_numbers<[1], [0], [0], [1], [0, 0, 1, 1], [], []>} : vector<8x16xf32>, vector<16x32xf32>, vector<8x32xf32> -> vector<8x32xf32>
    %64 = arith.addf %45, %63 : vector<8x32xf32>
    %c0_40 = arith.constant 0 : index
    %c0_41 = arith.constant 0 : index
    %c0_42 = arith.constant 0 : index
    %65 = vector.load %arg11[%c0_40, %c0_41, %c0_42] : memref<1x1x32xf32, #tpu.memory_space<vmem>>, vector<1x1x32xf32>
    %66 = vector.shape_cast %65 : vector<1x1x32xf32> to vector<1x32xf32>
    %67 = vector.broadcast %66 : vector<1x32xf32> to vector<8x32xf32>
    %68 = arith.addf %64, %67 : vector<8x32xf32>
    %69 = arith.addf %3, %68 : vector<8x32xf32>
    %cst_43 = arith.constant dense<0.000000e+00> : vector<8x32xf32>
    %70 = tpu.matmul %4, %69, %cst_43 {dimension_numbers = #tpu.dot_dimension_numbers<[1], [0], [0], [1], [0, 0, 1, 1], [], []>} : vector<8x8xf32>, vector<8x32xf32>, vector<8x32xf32> -> vector<8x32xf32>
    %c0_44 = arith.constant 0 : index
    %c0_45 = arith.constant 0 : index
    %c0_46 = arith.constant 0 : index
    %71 = vector.load %arg12[%c0_44, %c0_45, %c0_46] : memref<1x32x64xf32, #tpu.memory_space<vmem>>, vector<1x32x64xf32>
    %72 = vector.shape_cast %71 : vector<1x32x64xf32> to vector<32x64xf32>
    %cst_47 = arith.constant dense<0.000000e+00> : vector<8x64xf32>
    %73 = tpu.matmul %70, %72, %cst_47 {dimension_numbers = #tpu.dot_dimension_numbers<[1], [0], [0], [1], [0, 0, 1, 1], [], []>} : vector<8x32xf32>, vector<32x64xf32>, vector<8x64xf32> -> vector<8x64xf32>
    %cst_48 = arith.constant 0.000000e+00 : f32
    %74 = vector.broadcast %cst_48 : f32 to vector<8x64xf32>
    %75 = arith.maximumf %73, %74 : vector<8x64xf32>
    %c0_49 = arith.constant 0 : index
    %c0_50 = arith.constant 0 : index
    %c0_51 = arith.constant 0 : index
    %76 = vector.load %arg13[%c0_49, %c0_50, %c0_51] : memref<1x64x32xf32, #tpu.memory_space<vmem>>, vector<1x64x32xf32>
    %77 = vector.shape_cast %76 : vector<1x64x32xf32> to vector<64x32xf32>
    %cst_52 = arith.constant dense<0.000000e+00> : vector<8x32xf32>
    %78 = tpu.matmul %75, %77, %cst_52 {dimension_numbers = #tpu.dot_dimension_numbers<[1], [0], [0], [1], [0, 0, 1, 1], [], []>} : vector<8x64xf32>, vector<64x32xf32>, vector<8x32xf32> -> vector<8x32xf32>
    %79 = arith.addf %70, %78 : vector<8x32xf32>
    %cst_53 = arith.constant dense<0.000000e+00> : vector<8x32xf32>
    %80 = tpu.matmul %4, %79, %cst_53 {dimension_numbers = #tpu.dot_dimension_numbers<[1], [0], [0], [1], [0, 0, 1, 1], [], []>} : vector<8x8xf32>, vector<8x32xf32>, vector<8x32xf32> -> vector<8x32xf32>
    %c0_54 = arith.constant 0 : index
    %c0_55 = arith.constant 0 : index
    %81 = vector.load %arg17[%c0_54, %c0_55] : memref<8x32xf32, #tpu.memory_space<vmem>>, vector<8x32xf32>
    tpu.vector_store %arg17[%c0_54, %c0_55], %80 {strides = array<i32>} : memref<8x32xf32, #tpu.memory_space<vmem>>, vector<8x32xf32>,
    %c1_i32 = arith.constant 1 : i32
    %82 = arith.cmpi eq, %arg1, %c1_i32 : i32
    %83 = arith.extui %82 : i1 to i32
    %c0_i32_56 = arith.constant 0 : i32
    %84 = arith.cmpi ne, %83, %c0_i32_56 : i32
    scf.if %84 {
      %cst_57 = arith.constant dense<0.000000e+00> : vector<8xf32>
      %85 = vector.multi_reduction <add>, %80, %cst_57 [1] : vector<8x32xf32> to vector<8xf32>
      %86 = vector.shape_cast %85 : vector<8xf32> to vector<8x1xf32>
      %cst_58 = arith.constant 3.200000e+01 : f32
      %87 = vector.broadcast %cst_58 : f32 to vector<8x1xf32>
      %88 = arith.divf %86, %87 : vector<8x1xf32>
      %89 = vector.broadcast %88 : vector<8x1xf32> to vector<8x32xf32>
      %90 = arith.subf %80, %89 : vector<8x32xf32>
      %91 = arith.mulf %90, %90 : vector<8x32xf32>
      %cst_59 = arith.constant dense<0.000000e+00> : vector<8xf32>
      %92 = vector.multi_reduction <add>, %91, %cst_59 [1] : vector<8x32xf32> to vector<8xf32>
      %93 = vector.shape_cast %92 : vector<8xf32> to vector<8x1xf32>
      %cst_60 = arith.constant 3.200000e+01 : f32
      %94 = vector.broadcast %cst_60 : f32 to vector<8x1xf32>
      %95 = arith.divf %93, %94 : vector<8x1xf32>
      %96 = vector.broadcast %88 : vector<8x1xf32> to vector<8x32xf32>
      %97 = arith.subf %80, %96 : vector<8x32xf32>
      %cst_61 = arith.constant 9.99999974E-6 : f32
      %98 = vector.broadcast %cst_61 : f32 to vector<8x1xf32>
      %99 = arith.addf %95, %98 : vector<8x1xf32>
      %100 = math.rsqrt %99 : vector<8x1xf32>
      %101 = vector.broadcast %100 : vector<8x1xf32> to vector<8x32xf32>
      %102 = arith.mulf %97, %101 : vector<8x32xf32>
      %c0_62 = arith.constant 0 : index
      %c0_63 = arith.constant 0 : index
      %103 = vector.load %arg14[%c0_62, %c0_63] : memref<1x32xf32, #tpu.memory_space<vmem>>, vector<1x32xf32>
      %104 = vector.broadcast %103 : vector<1x32xf32> to vector<8x32xf32>
      %105 = arith.mulf %102, %104 : vector<8x32xf32>
      %c0_64 = arith.constant 0 : index
      %c0_65 = arith.constant 0 : index
      %106 = vector.load %arg15[%c0_64, %c0_65] : memref<1x32xf32, #tpu.memory_space<vmem>>, vector<1x32xf32>
      %107 = vector.broadcast %106 : vector<1x32xf32> to vector<8x32xf32>
      %108 = arith.addf %105, %107 : vector<8x32xf32>
      %cst_66 = arith.constant dense<0.000000e+00> : vector<32xf32>
      %109 = vector.multi_reduction <add>, %108, %cst_66 [0] : vector<8x32xf32> to vector<32xf32>
      %110 = vector.shape_cast %109 : vector<32xf32> to vector<1x32xf32>
      %cst_67 = arith.constant 8.000000e+00 : f32
      %111 = vector.broadcast %cst_67 : f32 to vector<1x32xf32>
      %112 = arith.divf %110, %111 : vector<1x32xf32>
      %113 = vector.broadcast %112 : vector<1x32xf32> to vector<8x32xf32>
      %114 = arith.subf %108, %113 : vector<8x32xf32>
      %c0_68 = arith.constant 0 : index
      %c0_69 = arith.constant 0 : index
      %c0_70 = arith.constant 0 : index
      %115 = vector.load %arg16[%c0_68, %c0_69, %c0_70] : memref<1x8x32xf32, #tpu.memory_space<vmem>>, vector<1x8x32xf32>
      %116 = vector.shape_cast %115 : vector<1x8x32xf32> to vector<8x32xf32>
      %117 = vector.shape_cast %114 : vector<8x32xf32> to vector<1x8x32xf32>
      tpu.vector_store %arg16[%c0_68, %c0_69, %c0_70], %117 {strides = array<i32>} : memref<1x8x32xf32, #tpu.memory_space<vmem>>, vector<1x8x32xf32>,
    } else {
    }
    return
  }
  func.func @transform_0(%arg0: i32, %arg1: i32) -> (i32, i32, i32) {
    %c0_i32 = arith.constant 0 : i32
    %c0_i32_0 = arith.constant 0 : i32
    %c0_i32_1 = arith.constant 0 : i32
    return %arg0, %c0_i32, %c0_i32_0 : i32, i32, i32
  }
  func.func @transform_1(%arg0: i32, %arg1: i32) -> (i32, i32) {
    %c0_i32 = arith.constant 0 : i32
    %c0_i32_0 = arith.constant 0 : i32
    %c0_i32_1 = arith.constant 0 : i32
    return %c0_i32, %c0_i32_0 : i32, i32
  }
  func.func @transform_2(%arg0: i32, %arg1: i32) -> (i32, i32, i32) {
    %c0_i32 = arith.constant 0 : i32
    %c0_i32_0 = arith.constant 0 : i32
    %c0_i32_1 = arith.constant 0 : i32
    return %arg1, %c0_i32, %c0_i32_0 : i32, i32, i32
  }
  func.func @transform_3(%arg0: i32, %arg1: i32) -> (i32, i32, i32) {
    %c0_i32 = arith.constant 0 : i32
    %c0_i32_0 = arith.constant 0 : i32
    %c0_i32_1 = arith.constant 0 : i32
    return %arg1, %c0_i32, %c0_i32_0 : i32, i32, i32
  }
  func.func @transform_4(%arg0: i32, %arg1: i32) -> (i32, i32, i32) {
    %c0_i32 = arith.constant 0 : i32
    %c0_i32_0 = arith.constant 0 : i32
    %c0_i32_1 = arith.constant 0 : i32
    return %arg1, %c0_i32, %c0_i32_0 : i32, i32, i32
  }
  func.func @transform_5(%arg0: i32, %arg1: i32) -> (i32, i32, i32) {
    %c0_i32 = arith.constant 0 : i32
    %c0_i32_0 = arith.constant 0 : i32
    %c0_i32_1 = arith.constant 0 : i32
    return %arg1, %c0_i32, %c0_i32_0 : i32, i32, i32
  }
  func.func @transform_6(%arg0: i32, %arg1: i32) -> (i32, i32, i32) {
    %c0_i32 = arith.constant 0 : i32
    %c0_i32_0 = arith.constant 0 : i32
    %c0_i32_1 = arith.constant 0 : i32
    return %arg1, %c0_i32, %c0_i32_0 : i32, i32, i32
  }
  func.func @transform_7(%arg0: i32, %arg1: i32) -> (i32, i32, i32) {
    %c0_i32 = arith.constant 0 : i32
    %c0_i32_0 = arith.constant 0 : i32
    %c0_i32_1 = arith.constant 0 : i32
    return %arg1, %c0_i32, %c0_i32_0 : i32, i32, i32
  }
  func.func @transform_8(%arg0: i32, %arg1: i32) -> (i32, i32, i32) {
    %c0_i32 = arith.constant 0 : i32
    %c0_i32_0 = arith.constant 0 : i32
    %c0_i32_1 = arith.constant 0 : i32
    return %arg1, %c0_i32, %c0_i32_0 : i32, i32, i32
  }
  func.func @transform_9(%arg0: i32, %arg1: i32) -> (i32, i32, i32) {
    %c0_i32 = arith.constant 0 : i32
    %c0_i32_0 = arith.constant 0 : i32
    %c0_i32_1 = arith.constant 0 : i32
    return %arg1, %c0_i32, %c0_i32_0 : i32, i32, i32
  }
  func.func @transform_10(%arg0: i32, %arg1: i32) -> (i32, i32, i32) {
    %c0_i32 = arith.constant 0 : i32
    %c0_i32_0 = arith.constant 0 : i32
    %c0_i32_1 = arith.constant 0 : i32
    return %arg1, %c0_i32, %c0_i32_0 : i32, i32, i32
  }
  func.func @transform_11(%arg0: i32, %arg1: i32) -> (i32, i32, i32) {
    %c0_i32 = arith.constant 0 : i32
    %c0_i32_0 = arith.constant 0 : i32
    %c0_i32_1 = arith.constant 0 : i32
    return %arg1, %c0_i32, %c0_i32_0 : i32, i32, i32
  }
  func.func @transform_12(%arg0: i32, %arg1: i32) -> (i32, i32) {
    %c0_i32 = arith.constant 0 : i32
    %c0_i32_0 = arith.constant 0 : i32
    %c0_i32_1 = arith.constant 0 : i32
    return %c0_i32, %c0_i32_0 : i32, i32
  }
  func.func @transform_13(%arg0: i32, %arg1: i32) -> (i32, i32) {
    %c0_i32 = arith.constant 0 : i32
    %c0_i32_0 = arith.constant 0 : i32
    %c0_i32_1 = arith.constant 0 : i32
    return %c0_i32, %c0_i32_0 : i32, i32
  }
  func.func @transform_14(%arg0: i32, %arg1: i32) -> (i32, i32, i32) {
    %c0_i32 = arith.constant 0 : i32
    %c0_i32_0 = arith.constant 0 : i32
    %c0_i32_1 = arith.constant 0 : i32
    return %arg0, %c0_i32, %c0_i32_0 : i32, i32, i32
  }
}

</mosaic_0001>

<bundles_post_ra>
// kernel: tpu_custom_call.1
= control target key start
LH: loop header
LB: loop body
LE: loop exit
PB: predicated region body
PF: predicated region fallthrough
CT: control target
= control target key end

     0   :  { %s3322_s0 = inlined_call_operand.hbm [shape: f32[2,8,32], index: 0, kind: input, shape index: {}]   ;;  %s3323_s1 = inlined_call_operand.hbm [shape: f32[8,8], index: 1, kind: input, shape index: {}]   ;;  %s3324_s2 = inlined_call_operand.vmem [shape: f32[2,32,32], index: 2, kind: input, shape index: {}]   ;;  %s3325_s3 = inlined_call_operand.vmem [shape: f32[2,1,32], index: 3, kind: input, shape index: {}]   ;;  %s3326_s4 = inlined_call_operand.vmem [shape: f32[2,32,32], index: 4, kind: input, shape index: {}]   ;;  %s3327_s5 = inlined_call_operand.vmem [shape: f32[2,1,32], index: 5, kind: input, shape index: {}]   ;;  %s3328_s6 = inlined_call_operand.vmem [shape: f32[2,32,32], index: 6, kind: input, shape index: {}]   ;;  %s3329_s7 = inlined_call_operand.vmem [shape: f32[2,1,32], index: 7, kind: input, shape index: {}]   ;;  %s3330_s8 = inlined_call_operand.hbm [shape: f32[2,32,32], index: 8, kind: input, shape index: {}]   ;;  %s3331_s9 = inlined_call_operand.vmem [shape: f32[2,1,32], index: 9, kind: input, shape index: {}]   ;;  %s3332_s10 = inlined_call_operand.hbm [shape: f32[2,32,64], index: 10, kind: input, shape index: {}]   ;;  %s3333_s11 = inlined_call_operand.vmem [shape: f32[2,64,32], index: 11, kind: input, shape index: {}]   ;;  %s3334_s12 = inlined_call_operand.vmem [shape: f32[1,32], index: 12, kind: input, shape index: {}]   ;;  %s3335_s13 = inlined_call_operand.vmem [shape: f32[1,32], index: 13, kind: input, shape index: {}]   ;;  %s3336_s14 = inlined_call_operand.hbm [shape: f32[2,8,32], index: 14, kind: output, shape index: {}]  }
   0x1   :  { %3362 = sst [smem:[#allocation30_spill]] %s3322_s0 }
   0x2   :  { %3363 = sst [smem:[#allocation31_spill]] %s3323_s1 }
   0x3   :  { %3364 = sst [smem:[#allocation32_spill]] %s3324_s2 }
   0x4   :  { %3365 = sst [smem:[#allocation33_spill]] %s3326_s4 }
   0x5   :  { %3366 = sst [smem:[#allocation34_spill]] %s3327_s5 }
   0x6   :  { %3367 = sst [smem:[#allocation35_spill]] %s3328_s6 }
   0x7   :  { %3368 = sst [smem:[#allocation36_spill]] %s3329_s7 }
   0x8   :  { %3369 = sst [smem:[#allocation37_spill]] %s3330_s8 }
   0x9   :  { %3370 = sst [smem:[#allocation38_spill]] %s3331_s9 }
   0xa   :  { %3371 = sst [smem:[#allocation39_spill]] %s3332_s10 }
   0xb   :  { %3372 = sst [smem:[#allocation40_spill]] %s3333_s11 }
   0xc   :  { %3373 = sst [smem:[#allocation41_spill]] %s3334_s12 }
   0xd   :  { %3374 = sst [smem:[#allocation42_spill]] %s3335_s13 }
   0xe   :  { %3375 = sst [smem:[#allocation43_spill]] %s3336_s14 }
   0xf   :  { %19 = vsyncpa [#allocation4], 0 }
  0x10   :  { %21 = vsyncpa [#allocation4 + $0x1], 0 }
  0x11   :  { %22 = vsyncpa [#allocation7], 0 }
  0x12   :  { %23 = vsyncpa [#allocation5], 0 }
  0x13   :  { %25 = vsyncpa [#allocation5 + $0x1], 0  ;;  %s2772_s29 = smov 0   ;;  %s2774_s30 = smov 0  }
  0x14   :  { %s2776_s15 = smov 0   ;;  %s2778_s16 = smov 0  }
  0x15   :  { %s2780_s17 = smov 0   ;;  %s2782_s18 = smov 0  }
  0x16   :  { %s2784_s19 = smov 0   ;;  %s2786_s20 = smov 0  }
  0x17   :  { %s2788_s21 = smov 0   ;;  %s2790_s22 = smov 0  }
  0x18   :  { %s2792_s23 = smov 0  }
  0x19 LB: > { %3376 = sst [smem:[#allocation15_spill]] %s2648_s30  ;;  %s40_s24 = sadd.s32 1, %s2676_s21  ;;  %s2684_s23 = sphi %s2792_s23, %s31_s23   ;;  %s2680_s22 = sphi %s2790_s22, %s3446_s22   ;;  %s2676_s21 = sphi %s2788_s21, %s3445_s21   ;;  %s2672_s20 = sphi %s2786_s20, %s3444_s20   ;;  %s2668_s19 = sphi %s2784_s19, %s3443_s19   ;;  %s2664_s18 = sphi %s2782_s18, %s3442_s18   ;;  %s2660_s17 = sphi %s2780_s17, %s3441_s17   ;;  %s2656_s16 = sphi %s2778_s16, %s3440_s16   ;;  %s2652_s15 = sphi %s2776_s15, %s3439_s15   ;;  %s2648_s30 = sphi %s2774_s30, %s3438_s30   ;;  %s2644_s29 = sphi %s2772_s29, %s3437_s29  }
  0x1a   : > { %3377 = sst [smem:[#allocation16_spill]] %s2652_s15  ;;  %s43_s25 = sadd.s32 1, %s2680_s22 }
  0x1b   : > { %3378 = sst [smem:[#allocation17_spill]] %s2656_s16  ;;  %p41_p0 = scmp.ge.s32.totalorder %s40_s24, 2 }
  0x1c   : > { %3379 = sst [smem:[#allocation18_spill]] %s2660_s17  ;;  %s50_s26 = sadd.s32 1, %s2664_s18 }
  0x1d   : > { %3380 = sst [smem:[#allocation19_spill]] %s2664_s18  ;;  %p3340_p1 = scmp.ne.s32.totalorder %s2664_s18, %s2660_s17 }
  0x1e   : > { %3381 = sst [smem:[#allocation20_spill]] %s2672_s20  ;;  %p58_p2 = scmp.eq.s32.totalorder %s2684_s23, 0 }
  0x1f   : > { %3382 = sst [smem:[#allocation21_spill]] %s2676_s21  ;;  %s3448_s24 = smov (%p41_p0, %s40_s24), 0 }
  0x20   : > { %3383 = sst [smem:[#allocation22_spill]] %s2680_s22  ;;  %s3450_s25 = smov (!%p41_p0, %s43_s25), %s2680_s22 }
  0x21   : > { %3384 = sst [smem:[#allocation23_spill]] %s2684_s23  ;;  %p2839_p3 = por %p58_p2, %p3340_p1 }
  0x22   : > { %3385 = sst [smem:[#allocation24_spill]] %s3448_s24  ;;  %s250_s28 = ssub.s32 %s2676_s21, %s3448_s24 }
  0x23   : > { %p45_p4 = scmp.ge.s32.totalorder %s3450_s25, 2  ;;  %p251_p5 = scmp.eq.s32.totalorder %s250_s28, 0 }
  0x24   : > { %s253_s14 = sadd.s32 1, %s2652_s15  ;;  %p260_p6 = scmp.ne.s32.totalorder %s2652_s15, %s2648_s30 }
  0x25   : > { %s3452_s25 = smov (%p45_p4, %s3450_s25), 0  ;;  %p2328_p9 = scmp.lt.s32.totalorder %s2684_s23, 4 }
  0x26   : > { %3387 = sst [smem:[#allocation25_spill]] %s3452_s25  ;;  %s47_s13 = ssub.s32 %s2680_s22, %s3452_s25 }
  0x27   : > { %s2851_s20 = scalar_select %p251_p5, %s2652_s15, %s253_s14  }
  0x28   : > { %p2855_p7 = por %p260_p6, %p58_p2  ;;  %p48_p8 = scmp.eq.s32.totalorder %s47_s13, 0 }
  0x29   : > { %3388 = sst [smem:[#allocation26_spill]] %s2851_s20  ;;  %s453_s24 = sand.u32 1, %s2684_s23  }
  0x2a   : > { %s2862_s11 = scalar_select %p48_p8, %s2664_s18, %s50_s26  }
  0x2b   : > { %s455_s28 = sand.u32 1, %s2664_s18   ;;  %s2047_s7 = sshll.u32 %s2680_s22, 7 }
  0x2c   : > { %3390 = sst [smem:[#allocation27_spill]] %s2862_s11  ;;  %s2046_s9 = sshll.u32 %s455_s28, 3 }
  0x2d   : > { %s3391_s0 = sld [smem:[#allocation30_spill]]  ;;  %s457_s25 = scalar_lea.vmem [#allocation3], %s2046_s9 }
  0x2e   : > { %s464_s20 = sshll.u32 %s457_s25, 4  ;;  %p2873_p10 = pnand %p2328_p9, %p2839_p3  ;;  %s2877_s20 = int_to_ptr.vmem [resolvable:$true] %s464_s20 }
  0x2f   : > { %p2881_p11 = pnand %p2328_p9, %p2855_p7  ;;  %s515_s6 = sand.u32 1, %s2652_s15  }
  0x30   : > { %p2438_p13 = pneg %p2873_p10 }
  0x33   : > { %s2869_s14 = scalar_lea.hbm %s3391_s0, %s2047_s7  ;;  %s2886_s7 = scalar_lea.sflag [#allocation4], %s453_s24 }
  0x34   : > { %s2436_s9 = scalar_lea.hbm %s2869_s14, 128  ;;  %s2441_s27 = scalar_lea.hbm %s3391_s0, 256 }
  0x35   : > { %p2437_p12 = scmp.ne.s32.totalorder %s2869_s14, %s2436_s9  ;;  %p2442_p3 = scmp.lt.u32.totalorder %s2869_s14, %s3391_s0 }
  0x36   : > { %p2443_p4 = scmp.lt.u32.totalorder %s2441_s27, %s2436_s9  ;;  %p2445_p6 = scmp.lt.u32.totalorder %s2436_s9, %s2869_s14 }
  0x37   : > { %p2439_p0 = pnand %p2438_p13, %p2437_p12 }
  0x38   : > { %p2444_p5 = por %p2443_p4, %p2442_p3 }
  0x39   : > { %p2440_p2 = pneg %p2439_p0 }
  0x3a   : > { %p2446_p7 = por %p2445_p6, %p2444_p5 }
  0x3c   : > { %p2447_p8 = pnand %p2446_p7, %p2440_p2 }
  0x3e   : > { %2450 = shalt.err (!%p2447_p8)
}
  0x3f   : > { %s2451_s24 = scalar_lea.vmem %s2877_s20, 128  ;;  %s2686_s25 = smov [#allocation3]  }
  0x40   : > { %p2452_p9 = scmp.ne.s32.totalorder %s2877_s20, %s2451_s24  ;;  %s2456_s26 = sshll.u32 %s2686_s25, 4  ;;  %s2457_s26 = int_to_ptr.vmem [resolvable:$false] %s2456_s26 }
  0x41   : > { %s2458_s12 = scalar_lea.vmem %s2457_s26, 256  ;;  %p2459_p1 = scmp.lt.s32.totalorder %s2877_s20, %s2457_s26 }
  0x42   : > { %p2454_p12 = pnand %p2452_p9, %p2438_p13  ;;  %p2460_p3 = scmp.lt.s32.totalorder %s2458_s12, %s2451_s24 }
  0x44   : > { %p2455_p0 = pneg %p2454_p12  ;;  %p2461_p4 = por %p2460_p3, %p2459_p1 }
  0x46   : > { %p2462_p5 = pnand %p2461_p4, %p2455_p0 }
  0x48   : > { %2465 = shalt.err (!%p2462_p5)
}
  0x49   : > { %2316 = dma.hbm_to_vmem [thread:$0]  (!%p2873_p10), %s2869_s14, 128, %s2877_s20, %s2886_s7  }
  0x4a   : > { %s2916_s9 = sshll.u32 %s515_s6, 5  ;;  %s2095_s27 = sshll.u32 %s2676_s21, 9 }
  0x4b   : > { %s3394_s8 = sld [smem:[#allocation37_spill]]  ;;  %s517_s13 = scalar_lea.vmem [#allocation8], %s2916_s9 }
  0x4c   : > { %s524_s26 = sshll.u32 %s517_s13, 4  ;;  %p3341_p10 = pneg %p2881_p11  ;;  %s2927_s26 = int_to_ptr.vmem [resolvable:$true] %s524_s26 }
  0x51   : > { %s2924_s25 = scalar_lea.hbm %s3394_s8, %s2095_s27  ;;  %s2471_s12 = scalar_lea.hbm %s3394_s8, 1024 }
  0x52   : > { %s2466_s20 = scalar_lea.hbm %s2924_s25, 512  ;;  %p2472_p6 = scmp.lt.u32.totalorder %s2924_s25, %s3394_s8 }
  0x53   : > { %p2467_p1 = scmp.ne.s32.totalorder %s2924_s25, %s2466_s20  ;;  %p2473_p7 = scmp.lt.u32.totalorder %s2471_s12, %s2466_s20 }
  0x54   : > { %p2475_p9 = scmp.lt.u32.totalorder %s2466_s20, %s2924_s25 }
  0x55   : > { %p2469_p13 = pnand %p3341_p10, %p2467_p1  ;;  %p2474_p8 = por %p2473_p7, %p2472_p6 }
  0x57   : > { %p2470_p2 = pneg %p2469_p13  ;;  %p2476_p12 = por %p2475_p9, %p2474_p8 }
  0x59   : > { %p2477_p0 = pnand %p2476_p12, %p2470_p2 }
  0x5b   : > { %2480 = shalt.err (!%p2477_p0)
}
  0x5c   : > { %s2481_s13 = scalar_lea.vmem %s2927_s26, 512  ;;  %s2687_s14 = smov [#allocation8]  }
  0x5d   : > { %p2482_p3 = scmp.ne.s32.totalorder %s2927_s26, %s2481_s13  ;;  %s2486_s6 = sshll.u32 %s2687_s14, 4  ;;  %s2487_s6 = int_to_ptr.vmem [resolvable:$false] %s2486_s6 }
  0x5e   : > { %s2488_s28 = scalar_lea.vmem %s2487_s6, 1024  ;;  %p2489_p1 = scmp.lt.s32.totalorder %s2927_s26, %s2487_s6 }
  0x5f   : > { %p2484_p4 = pnand %p2482_p3, %p3341_p10  ;;  %p2490_p13 = scmp.lt.s32.totalorder %s2488_s28, %s2481_s13 }
  0x61   : > { %p2485_p5 = pneg %p2484_p4  ;;  %p2491_p6 = por %p2490_p13, %p2489_p1 }
  0x63   : > { %p2492_p7 = pnand %p2491_p6, %p2485_p5 }
  0x65   : > { %2495 = shalt.err (!%p2492_p7)
}
  0x66   : > { %s3342_s20 = smov 128   ;;  %s3343_s12 = smov 8  }
  0x67   : > { %2319 = dma.hbm_to_vmem [thread:$0]  (!%p2881_p11), %s2924_s25, 512, %s2927_s26, %s2886_s7, %s3342_s20, %s3342_s20, %s3343_s12  }
  0x68   : > { %s2959_s24 = sadd.s32 4294967295, %s2684_s23   ;;  %s2042_s13 = sadd.s32 4294967294, %s2684_s23  }
  0x69   : > { %p63_p2 = scmp.ne.s32.totalorder %s2660_s17, %s2656_s16  ;;  %p3346_p8 = scmp.eq.s32.totalorder %s2959_s24, 0 }
  0x6a   : > { %p266_p9 = scmp.ne.s32.totalorder %s2648_s30, %s2644_s29  ;;  %p410_p12 = scmp.eq.s32.totalorder %s2959_s24, 3 }
  0x6b   : > { %p416_p0 = scmp.eq.s32.totalorder %s2042_s13, 3  ;;  %p2970_p3 = por %p3346_p8, %p63_p2 }
  0x6c   : > { %p2976_p4 = por %p266_p9, %p3346_p8  ;;  %p3397_p5 = scmp.ne.s32.totalorder %s2664_s18, %s2660_s17 }
  0x6d   : > { %s3395_s14 = scalar_select %p2970_p3, 1, 0 }
  0x6e   : > { %s3396_s25 = scalar_select %p2976_p4, 1, 0 }
  0x6f   : > { %p2983_p1 = por %p410_p12, %p3397_p5  ;;  %p2987_p13 = por %p416_p0, %p63_p2 }
  0x70   : > { %p2043_p6 = scmp.ge.s32.totalorder %s2684_s23, 1  ;;  %p423_p7 = scmp.lt.s32.totalorder %s2684_s23, 5 }
  0x71   : > { %s3398_s26 = scalar_select %p2983_p1, 1, 0 }
  0x72   : > { %s3400_s29 = scalar_select %p2987_p13, 1, 0 }
  0x73   : > { %3399 = sst [smem:[#allocation28_spill]] %s3398_s26  ;;  %p2993_p10 = pnand %p2043_p6, %p423_p7 }
  0x74   : > { %3401 = sst [smem:[#allocation29_spill]] %s3400_s29  ;;  %s2690_s28 = smov [#allocation6]  }
  0x75   : > { %s3402_s6 = scalar_select %p2993_p10, 1, 0 }
  0x76   : > { %s436_s13 = sshll.u32 %s2690_s28, 4  ;;  %p2309_p9 = pneg %p2993_p10  ;;  %s3006_s13 = int_to_ptr.vmem [resolvable:$true] %s436_s13 }
  0x77   : > { %s3403_s10 = sld [smem:[#allocation39_spill]]  ;;  %s544_s8 = scalar_lea.vmem [#allocation9], %s2916_s9 }
  0x78   : > { %s551_s22 = sshll.u32 %s544_s8, 4  ;;  %p3011_p2 = pnand %p2309_p9, %p3346_p8  ;;  %s3015_s22 = int_to_ptr.vmem [resolvable:$true] %s551_s22 }
  0x79   : > { %p3405_p0 = pneg %p2881_p11 }
  0x7d   : > { %s3004_s0 = scalar_lea.hbm %s3403_s10, %s2095_s27  ;;  %s2501_s12 = scalar_lea.hbm %s3403_s10, 1024 }
  0x7e   : > { %s2496_s28 = scalar_lea.hbm %s3004_s0, 512  ;;  %p2502_p7 = scmp.lt.u32.totalorder %s3004_s0, %s3403_s10 }
  0x7f   : > { %p2497_p12 = scmp.ne.s32.totalorder %s3004_s0, %s2496_s28  ;;  %p2503_p9 = scmp.lt.u32.totalorder %s2501_s12, %s2496_s28 }
  0x80   : > { %p2505_p13 = scmp.lt.u32.totalorder %s2496_s28, %s3004_s0 }
  0x81   : > { %p2499_p5 = pnand %p2497_p12, %p3405_p0  ;;  %p2504_p8 = por %p2503_p9, %p2502_p7 }
  0x83   : > { %p2500_p6 = pneg %p2499_p5  ;;  %p2506_p1 = por %p2505_p13, %p2504_p8 }
  0x85   : > { %p2507_p4 = pnand %p2506_p1, %p2500_p6 }
  0x87   : > { %2510 = shalt.err (!%p2507_p4)
}
  0x88   : > { %s2511_s8 = scalar_lea.vmem %s3015_s22, 512  ;;  %s2691_s27 = smov [#allocation9]  }
  0x89   : > { %p2512_p12 = scmp.ne.s32.totalorder %s3015_s22, %s2511_s8  ;;  %s2516_s20 = sshll.u32 %s2691_s27, 4  ;;  %s2517_s20 = int_to_ptr.vmem [resolvable:$false] %s2516_s20 }
  0x8a   : > { %s2518_s21 = scalar_lea.vmem %s2517_s20, 1024  ;;  %p2519_p10 = scmp.lt.s32.totalorder %s3015_s22, %s2517_s20 }
  0x8b   : > { %p2514_p5 = pnand %p2512_p12, %p3405_p0  ;;  %p2520_p7 = scmp.lt.s32.totalorder %s2518_s21, %s2511_s8 }
  0x8d   : > { %p2515_p3 = pneg %p2514_p5  ;;  %p2521_p9 = por %p2520_p7, %p2519_p10 }
  0x8f   : > { %p2522_p8 = pnand %p2521_p9, %p2515_p3 }
  0x91   : > { %2525 = shalt.err (!%p2522_p8)
}
  0x92   : > { %s3406_s28 = smov 8   ;;  %s3407_s12 = smov 128  }
  0x93   : > { %2322 = dma.hbm_to_vmem [thread:$0]  (!%p2881_p11), %s3004_s0, 512, %s3015_s22, %s2886_s7, %s3407_s12, %s3407_s12, %s3406_s28  }
  0x94   : > { %s3408_s1 = sld [smem:[#allocation31_spill]]  ;;  %p2528_p3 = pneg %p3011_p2 }
  0x9a   : > { %s2526_s27 = scalar_lea.hbm %s3408_s1, 128 }
  0x9b   : > { %p2527_p10 = scmp.ne.s32.totalorder %s3408_s1, %s2526_s27  ;;  %p2533_p13 = scmp.lt.u32.totalorder %s2526_s27, %s3408_s1 }
  0x9d   : > { %p2529_p4 = pnand %p2528_p3, %p2527_p10 }
  0x9f   : > { %p2530_p1 = pneg %p2529_p4 }
  0xa1   : > { %p2535_p6 = pnand %p2533_p13, %p2530_p1 }
  0xa3   : > { %2538 = shalt.err (!%p2535_p6)
}
  0xa4   : > { %s2539_s0 = scalar_lea.vmem %s3006_s13, 128  ;;  %p2547_p5 = scmp.lt.s32.totalorder %s3006_s13, %s3006_s13 }
  0xa5   : > { %p2540_p11 = scmp.ne.s32.totalorder %s3006_s13, %s2539_s0  ;;  %p2548_p7 = scmp.lt.s32.totalorder %s2539_s0, %s2539_s0 }
  0xa7   : > { %p2542_p12 = pnand %p2540_p11, %p2528_p3  ;;  %p2549_p9 = por %p2548_p7, %p2547_p5 }
  0xa9   : > { %p2543_p0 = pneg %p2542_p12 }
  0xab   : > { %p2550_p8 = pnand %p2549_p9, %p2543_p0 }
  0xad   : > { %2553 = shalt.err (!%p2550_p8)
}
  0xae   : > { %2312 = dma.hbm_to_vmem [thread:$0]  (!%p3011_p2), %s3408_s1, 128, %s3006_s13, [#allocation7]  }
  0xaf   : > { %p3409_p10 = scmp.ne.s32.totalorder %s3402_s6, 0 }
  0xb0   : > { %s573_s22 = sand.u32 (!%p3409_p10), 1, %s2959_s24   ;;  %s3352_s7 = sand.u32 (!%p3409_p10), 1, %s2660_s17  }
  0xb1   : > { %571 = sbr.rel (%p3409_p10) target bundleno = 3137 (0xc41), region = 76  ;;  %s3071_s21 = sshll.u32 (!%p3409_p10), %s3352_s7, 3 }
  0xb2   : > { %s574_s28 = scalar_lea.sflag (!%p3409_p10), [#allocation4], %s573_s22  ;;  %s577_s11 = scalar_lea.vmem (!%p3409_p10), [#allocation3], %s3071_s21 }
  0xb3   : > { %p3410_p3 = scmp.ne.s32.totalorder (!%p3409_p10), %s3395_s14, 0 }
  0xb8   : > { %2627 = dma.done.wait (%p3410_p3), %s574_s28, 128  }
  0xb9   : > { %2629 = vsyncadd (%p3410_p3), %s574_s28, 4294967168  ;;  %p3411_p2 = scmp.eq.s32.totalorder %s2959_s24, 0 }
  0xbb   : > { %2631 = dma.done.wait (%p3411_p2), [#allocation7], 128   ;;  %p3412_p4 = pmov %p3411_p2 }
  0xbc   : > { %s588_s6 = sand.u32 1, %s2648_s30   ;;  %p3413_p1 = scmp.ne.s32.totalorder %s3396_s25, 0 }
  0xbd   : > { %2633 = vsyncadd (%p3412_p4), [#allocation7], 4294967168  ;;  %s2057_s13 = sshll.u32 %s588_s6, 5 }
  0xbe   : > { %s3083_s12 = scalar_lea.vmem [#allocation8], %s2057_s13 }
  0xbf   : > { %2635 = dma.done.wait (%p3413_p1), %s574_s28, 1024  }
  0xc0   : > { %2637 = vsyncadd (%p3413_p1), %s574_s28, 4294966272  ;;  %p686_p13 = scmp.lt.s32.totalorder %s2668_s19, 1  ;;  %s3414_s2 = sld [smem:[#allocation32_spill]] }
  0xc1   : > { %s3415_s4 = sld [smem:[#allocation33_spill]]  ;;  %s3416_s6 = sld [smem:[#allocation34_spill]] }
  0xc2   : > { %s3091_s14 = scalar_select %p686_p13, %s2668_s19, 1 }
  0xc3   : > { %s3417_s30 = sld [smem:[#allocation35_spill]]  ;;  %s3418_s27 = sld [smem:[#allocation36_spill]] }
  0xc4   : > { %s2097_s24 = sshll.u32 %s3091_s14, 5  ;;  %s3419_s25 = sld [smem:[#allocation38_spill]] }
  0xc5   : > { %s2100_s26 = sshll.u32 %s3091_s14, 6  ;;  %s3127_s22 = scalar_lea.vmem [#allocation9], %s2057_s13 }
  0xc6   : > { %s690_s8 = scalar_lea.vmem %s3414_s2, %s2097_s24  ;;  %s685_s28 = scalar_lea.vmem [#allocation10], %s3071_s21 }
  0xc7   : > { %s698_s18 = scalar_lea.vmem %s3415_s4, %s2097_s24  ;;  %s701_s7 = scalar_lea.vmem %s3416_s6, %s3091_s14 }
  0xc8   : > { %s3420_s4 = sld [smem:[#allocation40_spill]]  ;;  %p2068_p6 = scmp.ne.s32.totalorder %s2668_s19, 0 }
  0xc9   : > { %s3111_s29 = scalar_lea.vmem %s3417_s30, %s2097_s24  ;;  %s709_s20 = scalar_lea.vmem %s3418_s27, %s3091_s14  ;;  %v722_v0 = vld [vmem:[%s577_s11] sm:$0xff] (!%p2068_p6)  ;;  %vm723_vm0 = vcmask (!%p2068_p6), 261120  }
  0xca   : > { %s712_s2 = scalar_lea.vmem %s3419_s25, %s3091_s14  ;;  %721 = sbr.rel (%p2068_p6) target bundleno = 209 (0xd1), region = 96  ;;  %724 = vst.msk [vmem:[#allocation2] sm:$0xff] (!%p2068_p6), %vm723_vm0, %v722_v0 }
  0xce   : > { %s3125_s17 = scalar_lea.vmem %s3420_s4, %s2100_s26 }
  0xd1 PF: > { %v727_v1 = vld [vmem:[%s690_s8] sm:$0xff]  ;;  %v728_v2 = vld [vmem:[%s690_s8 + $0x8] sm:$0xff]  ;;  %v2692_v4 = vmov 0.0|0.0   ;;  %v729_v7 = vld [vmem:[%s690_s8 + $0x10] sm:$0xff]  ;;  %vm2693_vm1 = vmmov 0   ;;  %v2694_v12 = vmov 0.0   ;;  %s3421_s30 = scalar_lea.vmem %s3325_s3, %s3091_s14 }
  0xd2   : > { %v813_v3 = vld [vmem:[%s698_s18] sm:$0xff]  ;;  %2255 = vmatprep.subr.bf16.mxu0 %v2692_v4  ;;  %2261 = vmatprep.subr.bf16.mxu1 %v2692_v4  ;;  %v2256_v5 = vpack.c.bf16 %v728_v2, %v727_v1  ;;  %v814_v6 = vld [vmem:[%s698_s18 + $0x8] sm:$0xff]  ;;  %v730_v8 = vld [vmem:[%s690_s8 + $0x18] sm:$0xff]  ;;  %vm738_vm2 = vcmask 261120   ;;  %vm975_vm3 = vcmask 130048   ;;  %s2695_s26 = smov 112  }
  0xd3   : > { %v2262_v9 = vpack.c.bf16 %v814_v6, %v813_v3  ;;  %v815_v10 = vld [vmem:[%s698_s18 + $0x10] sm:$0xff]  ;;  %v816_v11 = vld [vmem:[%s698_s18 + $0x18] sm:$0xff]  ;;  %2156 = vmatprep.mubr.msk.f32.mxu0 %vm2693_vm1, %v2694_v12  ;;  %2167 = vmatprep.mubr.msk.f32.mxu1 %vm2693_vm1, %v2694_v12  ;;  %v2259_v13 = vpack.c.bf16 %v730_v8, %v729_v7  ;;  %v3139_v15 = vld [vmem:[#allocation2] sm:$0xff]  ;;  %vm1052_vm4 = vcmask 64512   ;;  %vm1621_vm5 = vcmask 523264   ;;  %p2088_p11 = scmp.ne.s32.totalorder %s2668_s19, 1 }
  0xd4   : > { %2257 = vmatpush3.bf16.msra.mxu0 %v2256_v5  ;;  %v2265_v14 = vpack.c.bf16 %v816_v11, %v815_v10  ;;  %v2069_v16 = vld [vmem:[%s3421_s30] ss:$0 sm:$0xff]  ;;  %v895_v26 = vld [vmem:[%s3111_s29 + $0x8] sm:$0xff]  ;;  %v896_v27 = vld [vmem:[%s3111_s29 + $0x10] sm:$0xff]  ;;  %s3425_s19 = sld [smem:[#allocation41_spill]] (!%p2088_p11)  ;;  %s3426_s8 = sld [smem:[#allocation42_spill]] (!%p2088_p11) }
  0xd5   : > { %2263 = vmatpush3.bf16.msra.mxu1 %v2262_v9  ;;  %2258 = vmatprep.subr.bf16.mxu0 %v2692_v4  ;;  %v2071_v17 = vld [vmem:[%s701_s7] ss:$0 sm:$0xff]  ;;  %v897_v29 = vld [vmem:[%s3111_s29 + $0x18] sm:$0xff]  ;;  %v1305_v59 = vld [vmem:[%s3083_s12 + $0x10] sm:$0xff] }
  0xd6   : > { %2264 = vmatprep.subr.bf16.mxu1 %v2692_v4  ;;  %v894_v25 = vld [vmem:[%s3111_s29] sm:$0xff]  ;;  %v2271_v30 = vpack.c.bf16 %v897_v29, %v896_v27  ;;  %v1306_v60 = vld [vmem:[%s3083_s12 + $0x18] sm:$0xff]  ;;  %v1138_v0 = vld [vmem:[%s3083_s12 + $0x8] sm:$0xff] }
  0xd7   : > { %v2268_v28 = vpack.c.bf16 %v895_v26, %v894_v25  ;;  %v2073_v39 = vld [vmem:[%s709_s20] ss:$0 sm:$0xff]  ;;  %v2274_v61 = vpack.c.bf16 %v1306_v60, %v1305_v59  ;;  %v1536_v10 = vld [vmem:[%s3127_s22 + $0x8] sm:$0xff]  ;;  %v1537_v11 = vld [vmem:[%s3127_s22 + $0x10] sm:$0xff] }
  0xd8   : > { %2260 = vmatpush3.bf16.msra.mxu0 %v2259_v13  ;;  %v1137_v63 = vld [vmem:[%s3083_s12] sm:$0xff]  ;;  %v1614_v25 = vld [vmem:[%s3125_s17 + $0x8] sm:$0xff]  ;;  %v1615_v26 = vld [vmem:[%s3125_s17 + $0x10] sm:$0xff] }
  0xd9   : > { %2266 = vmatpush3.bf16.msra.mxu1 %v2265_v14  ;;  %2267 = vmatprep.subr.bf16.mxu0 %v2692_v4  ;;  %v2277_v2 = vpack.c.bf16 %v1138_v0, %v1137_v63  ;;  %v1535_v9 = vld [vmem:[%s3127_s22] sm:$0xff]  ;;  %v1538_v14 = vld [vmem:[%s3127_s22 + $0x18] sm:$0xff] }
  0xda   : > { %2181 = vmatprep.subr.mxu1 %v2694_v12  ;;  %v2280_v13 = vpack.c.bf16 %v1536_v10, %v1535_v9 }
  0xdb   : > { %2157 = vmatmul.mubr.msk.f32.vlgmr.msra.gmra.mrb[0].mxu0 %vm738_vm2, %v3139_v15 }
  0xdc   : > { %2168 = vmatmul.mubr.msk.f32.vlgmr.msra.gmra.mrb[0].mxu1 %vm738_vm2, %v3139_v15  ;;  %2178 = vmatprep.mubr.msk.f32.mxu0 %vm2693_vm1, %v2694_v12 }
  0xdd   : > { %2183 = vmatprep.mubr.msk.f32.mxu1 %vm2693_vm1, %v2694_v12  ;;  %2269 = vmatpush3.bf16.msra.mxu0 %v2268_v28  ;;  %v1616_v28 = vld [vmem:[%s3125_s17 + $0x18] sm:$0xff] }
  0xde   : > { %2270 = vmatprep.subr.bf16.mxu0 %v2692_v4  ;;  %v2289_v29 = vpack.c.bf16 %v1616_v28, %v1615_v26 }
  0xe1   : > { %2272 = vmatpush3.bf16.msra.mxu0 %v2271_v30  ;;  %v1618_v30 = vld [vmem:[%s3125_s17 + $0x28] sm:$0xff] }
  0xe2   : > { %2273 = vmatprep.subr.bf16.mxu0 %v2692_v4 }
  0xe4   : > { %2179 = vmatmul.mubr.msk.f32.vlgmr.msra.gmra.mrb[2].mxu0 %vm738_vm2, %v3139_v15 }
  0xe5   : > { %2205 = vmatprep.mubr.msk.f32.mxu0 %vm2693_vm1, %v2694_v12  ;;  %2275 = vmatpush3.bf16.msra.mxu0 %v2274_v61 }
  0xe6   : > { %2215 = vmatprep.subr.mxu0 %v2694_v12 }
 0x1ae   : > { %v808_v18 = vpop.f32.mrb[0].mxu0 }
 0x1af   : > { %v809_v19 = vadd.f32 %v2069_v16, %v808_v18  ;;  %v890_v20 = vpop.f32.mrb[0].mxu1  ;;  %v2158_v21 = vpop.f32.mrb[1].mxu0  ;;  %v2283_v16 = vpack.c.bf16 %v1538_v14, %v1537_v11  ;;  %v2083_v18 = vld [vmem:[%s712_s2] ss:$0 sm:$0xff] }
 0x1b0   : > { %v891_v22 = vadd.f32 %v2071_v17, %v890_v20  ;;  %v2169_v23 = vpop.f32.mrb[1].mxu1 }
 0x1b1   : > { %v812_v24 = vmul.f32 0.25, %v809_v19  ;;  %v726_v23 = vld [vmem:[#allocation6] sm:$0xff] }
 0x1b2   : > { %1141 = vrot.lane.b32.xlu1 %v891_v22, %s2695_s26  ;;  %2182 = vmatpush3.xpose.msk.msra.mxu1 %vm975_vm3, %v891_v22 }
 0x1b3   : > { %2186 = vmatprep.subr.mxu1 %v2694_v12 }
 0x1b5   : > { %2184 = vmatmul.mubr.msk.f32.vlgmr.msra.gmra.mrb[2].mxu1 %vm975_vm3, %v812_v24 }
 0x1b6   : > { %1139 = vrot.lane.b32.xlu1 %v812_v24, %s2695_s26  ;;  %2188 = vmatprep.mubr.msk.f32.mxu1 %vm2693_vm1, %v2694_v12  ;;  %v1613_v24 = vld [vmem:[%s3125_s17] sm:$0xff] }
 0x1b7   : > { %v971_v40 = vpop.f32.mrb[2].mxu0  ;;  %v2286_v27 = vpack.c.bf16 %v1614_v25, %v1613_v24 }
 0x1b8   : > { %v972_v41 = vadd.f32 %v2073_v39, %v971_v40  ;;  %v2180_v42 = vpop.f32.mrb[3].mxu0 }
 0x1ba   : > { %2187 = vmatpush3.msra.mxu1 %v972_v41 }
 0x1bb   : > { %2191 = vmatprep.subr.mxu1 %v2694_v12 }
 0x224   : > { %v1142_v45 = vpop.permute.xlu1 %1141 }
 0x228   : > { %v1140_v47 = vpop.permute.xlu1 %1139 }
 0x288   : > { %v1048_v31 = vpop.f32.mrb[2].mxu1 }
 0x289   : > { %v2185_v32 = vpop.f32.mrb[3].mxu1  ;;  %v1053_v33 = vsel %vm1052_vm4, %v1048_v31, -inf }
 0x28a   : > { %1054 = vmax.xlane.f32.xlu0 %v1053_v33 }
 0x317   : > { %v1055_v34 = vpop.xlane.xlu0 %1054 }
 0x318   : > { %v1056_v35 = vsub.f32 %v1048_v31, %v1055_v34  ;;  %v1619_v34 = vld [vmem:[%s3125_s17 + $0x30] sm:$0xff] }
 0x31a   : > { %v1057_v36 = vmul.f32 1.442695, %v1056_v35  ;;  %v1620_v35 = vld [vmem:[%s3125_s17 + $0x38] sm:$0xff] }
 0x31c   : > { %2426 = vpow2.f32 %v1057_v36  ;;  %v2295_v36 = vpack.c.bf16 %v1620_v35, %v1619_v34 }
 0x326   : > { %v2427_v37 = vpop.eup %2426 }
 0x327   : > { %v1059_v38 = vsel %vm1052_vm4, %v2427_v37, 0.0 }
 0x328   : > { %1060 = vadd.xlane.f32.xlu0 %v1059_v38 }
 0x3b5   : > { %v1061_v43 = vpop.xlane.xlu0 %1060 }
 0x3b6   : > { %2428 = vrcp.f32 %v1061_v43 }
 0x3c0   : > { %v2429_v44 = vpop.eup %2428 }
 0x3c1   : > { %v1063_v46 = vmul.f32 %v2429_v44, %v2427_v37 }
 0x3c3   : > { %2189 = vmatmul.mubr.msk.f32.vlgmr.msra.gmra.mrb[4].mxu1 %vm1052_vm4, %v1063_v46 }
 0x3c4   : > { %2192 = vmatpush3.xpose.msk.msra.mxu1 %vm975_vm3, %v1142_v45  ;;  %2193 = vmatprep.mubr.msk.f32.mxu1 %vm2693_vm1, %v2694_v12 }
 0x3c5   : > { %2196 = vmatprep.subr.mxu1 %v2694_v12 }
 0x3c7   : > { %2194 = vmatmul.mubr.msk.f32.vlgmr.msra.gmra.mrb[6].mxu1 %vm975_vm3, %v1140_v47 }
 0x3c8   : > { %2198 = vmatprep.mubr.msk.f32.mxu1 %vm2693_vm1, %v2694_v12 }
 0x496   : > { %v1133_v48 = vpop.f32.mrb[4].mxu1 }
 0x497   : > { %v2190_v49 = vpop.f32.mrb[5].mxu1 }
 0x49a   : > { %v1213_v50 = vpop.f32.mrb[6].mxu1 }
 0x49b   : > { %v2195_v51 = vpop.f32.mrb[7].mxu1  ;;  %v1217_v52 = vsel %vm1052_vm4, %v1213_v50, -inf }
 0x49c   : > { %1218 = vmax.xlane.f32.xlu0 %v1217_v52 }
 0x4b2   : > { %1229 = vrot.lane.b32.xlu0 %v972_v41, %s2695_s26 }
 0x529   : > { %v1219_v53 = vpop.xlane.xlu0 %1218 }
 0x52a   : > { %v1220_v54 = vsub.f32 %v1213_v50, %v1219_v53  ;;  %v2089_v53 = vld [vmem:[%s3425_s19] ss:$0 sm:$0xff] (!%p2088_p11) }
 0x52c   : > { %v1221_v55 = vmul.f32 1.442695, %v1220_v54 }
 0x52d   : > { %v1230_v56 = vpop.permute.xlu0 %1229 }
 0x52e   : > { %2430 = vpow2.f32 %v1221_v55  ;;  %2197 = vmatpush3.msra.mxu1 %v1230_v56  ;;  %v2090_v55 = vld [vmem:[%s3426_s8] ss:$0 sm:$0xff] (!%p2088_p11) }
 0x52f   : > { %2276 = vmatprep.subr.bf16.mxu1 %v2692_v4 }
 0x538   : > { %v2431_v57 = vpop.eup %2430 }
 0x539   : > { %v1223_v58 = vsel %vm1052_vm4, %v2431_v57, 0.0 }
 0x53a   : > { %1224 = vadd.xlane.f32.xlu1 %v1223_v58 }
 0x5c7   : > { %v1225_v62 = vpop.xlane.xlu1 %1224 }
 0x5c8   : > { %2432 = vrcp.f32 %v1225_v62 }
 0x5d2   : > { %v2433_v1 = vpop.eup %2432 }
 0x5d3   : > { %v1227_v3 = vmul.f32 %v2433_v1, %v2431_v57 }
 0x5d5   : > { %2199 = vmatmul.mubr.msk.f32.vlgmr.msra.gmra.mrb[8].mxu1 %vm1052_vm4, %v1227_v3 }
 0x5d6   : > { %2278 = vmatpush3.bf16.msra.mxu1 %v2277_v2  ;;  %2212 = vmatprep.mubr.msk.f32.mxu1 %vm2693_vm1, %v2694_v12 }
 0x5d7   : > { %2279 = vmatprep.subr.bf16.mxu1 %v2692_v4 }
 0x5d9   : > { %2213 = vmatmul.mubr.msk.f32.vlgmr.msra.gmra.mrb[10].mxu1 %vm975_vm3, %v1133_v48 }
 0x5da   : > { %2228 = vmatprep.mubr.msk.f32.mxu1 %vm2693_vm1, %v2694_v12  ;;  %2281 = vmatpush3.bf16.msra.mxu1 %v2280_v13 }
 0x5db   : > { %2282 = vmatprep.subr.bf16.mxu1 %v2692_v4 }
 0x5de   : > { %2284 = vmatpush3.bf16.msra.mxu1 %v2283_v16 }
 0x5df   : > { %2250 = vmatprep.subr.mxu1 %v2694_v12 }
 0x6a8   : > { %v1301_v5 = vpop.f32.mrb[8].mxu1 }
 0x6a9   : > { %v2200_v6 = vpop.f32.mrb[9].mxu1  ;;  %2206 = vmatmul.mubr.msk.f32.vlgmr.msra.gmra.mrb[4].mxu0 %vm975_vm3, %v1301_v5 }
 0x6aa   : > { %2217 = vmatprep.mubr.msk.f32.mxu0 %vm2693_vm1, %v2694_v12 }
 0x6ac   : > { %v1449_v7 = vpop.f32.mrb[10].mxu1 }
 0x6ad   : > { %v2214_v8 = vpop.f32.mrb[11].mxu1 }
 0x77c   : > { %v1376_v17 = vpop.f32.mrb[4].mxu0 }
 0x77d   : > { %v1450_v19 = vadd.f32 %v1449_v7, %v1376_v17  ;;  %v2207_v20 = vpop.f32.mrb[5].mxu0 }
 0x77f   : > { %v1460_v21 = vadd.f32 %v2083_v18, %v1450_v19 }
 0x781   : > { %v1461_v22 = vadd.f32 %v1460_v21, %v3139_v15  ;;  %v1617_v15 = vld [vmem:[%s3125_s17 + $0x20] sm:$0xff] }
 0x782   : > { %v2292_v31 = vpack.c.bf16 %v1618_v30, %v1617_v15 }
 0x783   : > { %2216 = vmatpush3.msra.mxu0 %v1461_v22 }
 0x784   : > { %2218 = vmatmul.mubr.msk.f32.vlgmr.msra.gmra.mrb[6].mxu0 %vm1052_vm4, %v726_v23  ;;  %2285 = vmatprep.subr.bf16.mxu0 %v2692_v4 }
 0x785   : > { %2247 = vmatprep.mubr.msk.f32.mxu0 %vm2693_vm1, %v2694_v12  ;;  %2287 = vmatpush3.bf16.msra.mxu0 %v2286_v27 }
 0x786   : > { %2288 = vmatprep.subr.bf16.mxu0 %v2692_v4 }
 0x789   : > { %2290 = vmatpush3.bf16.msra.mxu0 %v2289_v29 }
 0x78a   : > { %2291 = vmatprep.subr.bf16.mxu0 %v2692_v4 }
 0x78d   : > { %2293 = vmatpush3.bf16.msra.mxu0 %v2292_v31 }
 0x78e   : > { %2294 = vmatprep.subr.bf16.mxu0 %v2692_v4 }
 0x791   : > { %2296 = vmatpush3.bf16.msra.mxu0 %v2295_v36 }
 0x857   : > { %v1531_v32 = vpop.f32.mrb[6].mxu0 }
 0x858   : > { %v2219_v33 = vpop.f32.mrb[7].mxu0  ;;  %2229 = vmatmul.mubr.msk.f32.vlgmr.msra.gmra.mrb[12].mxu1 %vm738_vm2, %v1531_v32 }
 0x859   : > { %2252 = vmatprep.mubr.msk.f32.mxu1 %vm2693_vm1, %v2694_v12 }
 0x92b   : > { %v1608_v37 = vpop.f32.mrb[12].mxu1 }
 0x92c   : > { %v1612_v38 = vmax.f32 %v1608_v37, 0.0  ;;  %v2230_v39 = vpop.f32.mrb[13].mxu1 }
 0x92e   : > { %2248 = vmatmul.mubr.msk.f32.vlgmr.msra.gmra.mrb[8].mxu0 %vm1621_vm5, %v1612_v38 }
 0xa01   : > { %v1691_v40 = vpop.f32.mrb[8].mxu0 }
 0xa02   : > { %v1695_v41 = vadd.f32 %v1691_v40, %v1531_v32  ;;  %v2249_v42 = vpop.f32.mrb[9].mxu0 }
 0xa04   : > { %2251 = vmatpush3.msra.mxu1 %v1695_v41 }
 0xa05   : > { %2253 = vmatmul.mubr.msk.f32.vlgmr.msra.gmra.mrb[14].mxu1 %vm1052_vm4, %v726_v23 }
 0xad3   : > { %1770 = sbr.rel (%p2088_p11) target bundleno = 3108 (0xc24), region = 100 }
 0xad8   : > { %v1762_v4 = vpop.f32.mrb[14].mxu1 }
 0xad9   : > { %1766 = vst.msk [vmem:[#allocation2] sm:$0xff] %vm738_vm2, %v1762_v4  ;;  %v2254_v43 = vpop.f32.mrb[15].mxu1  ;;  %v1771_v12 = vsel (!%p2088_p11), %vm738_vm2, %v1762_v4, 0.0 }
 0xada   : > { %1772 = vadd.xlane.f32.xlu0 %v1771_v12 }
 0xb67   : > { %v1773_v44 = vpop.xlane.xlu0 %1772 }
 0xb68   : > { %v1775_v45 = vmul.f32 0.03125, %v1773_v44 }
 0xb6a   : > { %v1776_v46 = vsub.f32 %v1762_v4, %v1775_v45 }
 0xb6c   : > { %v1777_v47 = vmul.f32 %v1776_v46, %v1776_v46 }
 0xb6e   : > { %v1778_v48 = vsel %vm738_vm2, %v1777_v47, 0.0 }
 0xb6f   : > { %1779 = vadd.xlane.f32.xlu0 %v1778_v48 }
 0xbfc   : > { %v1780_v49 = vpop.xlane.xlu0 %1779 }
 0xbfd   : > { %v1781_v50 = vmul.f32 0.03125, %v1780_v49 }
 0xbff   : > { %v1782_v51 = vadd.f32 1e-05, %v1781_v50 }
 0xc01   : > { %2434 = vrsqrt.f32 %v1782_v51 }
 0xc0b   : > { %v2435_v52 = vpop.eup %2434 }
 0xc0c   : > { %v1784_v54 = vmul.f32 %v2435_v52, %v1776_v46 }
 0xc0e   : > { %v1792_v56 = vmul.f32 %v2089_v53, %v1784_v54 }
 0xc10   : > { %v1800_v57 = vadd.f32 %v2090_v55, %v1792_v56 }
 0xc12   : > { %v1801_v58 = vsel %vm738_vm2, %v1800_v57, 0.0 }
 0xc13   : > { %v1802_v59 = vrot.slane %v1801_v58, 4 }
 0xc15   : > { %v1803_v60 = vadd.f32 %v1802_v59, %v1801_v58 }
 0xc17   : > { %v1804_v61 = vrot.slane %v1803_v60, 2 }
 0xc19   : > { %v1805_v62 = vadd.f32 %v1804_v61, %v1803_v60 }
 0xc1b   : > { %v1806_v63 = vrot.slane %v1805_v62, 1 }
 0xc1d   : > { %v1807_v0 = vadd.f32 %v1806_v63, %v1805_v62 }
 0xc1f   : > { %v1809_v1 = vmul.f32 0.125, %v1807_v0 }
 0xc21   : > { %v1810_v2 = vsub.f32 %v1800_v57, %v1809_v1 }
 0xc23   : > { %1811 = vst.msk [vmem:[%s685_s28] sm:$0xff] %vm738_vm2, %v1810_v2 }
 0xc24 PF: > { %s3427_s18 = sld [smem:[#allocation20_spill]]  ;;  %s3428_s6 = sld [smem:[#allocation18_spill]] }
 0xc25   : > { %s3429_s9 = sld [smem:[#allocation28_spill]]  ;;  %s3430_s0 = sld [smem:[#allocation43_spill]] }
 0xc26   : > { %s1826_s22 = sshll.u32 %s685_s28, 4  ;;  %s2696_s15 = smov [#allocation10]   ;;  %s1827_s22 = int_to_ptr.vmem [resolvable:$true] %s1826_s22 }
 0xc27   : > { %s2554_s30 = scalar_lea.vmem %s1827_s22, 128  ;;  %s2558_s16 = sshll.u32 %s2696_s15, 4  ;;  %s2559_s16 = int_to_ptr.vmem [resolvable:$false] %s2558_s16 }
 0xc28   : > { %p2555_p12 = scmp.ne.s32.totalorder %s1827_s22, %s2554_s30  ;;  %s2560_s23 = scalar_lea.vmem %s2559_s16, 256 }
 0xc29   : > { %p2561_p9 = scmp.lt.s32.totalorder %s1827_s22, %s2559_s16  ;;  %p2562_p8 = scmp.lt.s32.totalorder %s2560_s23, %s2554_s30 }
 0xc2a   : > { %s2092_s27 = sshll.u32 %s3427_s18, 7  ;;  %s3431_s1 = sand.u32 1, %s3428_s6  }
 0xc2b   : > { %s3262_s10 = scalar_lea.hbm %s3430_s0, %s2092_s27  ;;  %s1813_s4 = scalar_lea.sflag [#allocation5], %s3431_s1 }
 0xc2c   : > { %p3432_p0 = scmp.ne.s32.totalorder %s3429_s9, 0  ;;  %p2563_p10 = por %p2562_p8, %p2561_p9 }
 0xc2e   : > { %p2556_p5 = pnand %p2555_p12, %p3432_p0 }
 0xc30   : > { %p2557_p7 = pneg %p2556_p5 }
 0xc32   : > { %p2564_p3 = pnand %p2563_p10, %p2557_p7 }
 0xc34   : > { %2567 = shalt.err (!%p2564_p3)
}
 0xc35   : > { %s2568_s21 = scalar_lea.hbm %s3262_s10, 128  ;;  %s2572_s29 = scalar_lea.hbm %s3430_s0, 256 }
 0xc36   : > { %p2569_p2 = scmp.ne.s32.totalorder %s3262_s10, %s2568_s21  ;;  %p2573_p13 = scmp.lt.u32.totalorder %s3262_s10, %s3430_s0 }
 0xc37   : > { %p2574_p6 = scmp.lt.u32.totalorder %s2572_s29, %s2568_s21  ;;  %p2576_p12 = scmp.lt.u32.totalorder %s2568_s21, %s3262_s10 }
 0xc38   : > { %p2570_p4 = pnand %p2569_p2, %p3432_p0 }
 0xc39   : > { %p2575_p11 = por %p2574_p6, %p2573_p13 }
 0xc3a   : > { %p2571_p1 = pneg %p2570_p4 }
 0xc3b   : > { %p2577_p5 = por %p2576_p12, %p2575_p11 }
 0xc3d   : > { %p2578_p7 = pnand %p2577_p5, %p2571_p1 }
 0xc3f   : > { %2581 = shalt.err (!%p2578_p7)
}
 0xc40   : > { %2307 = dma.vmem_to_hbm [thread:$0]  (%p3432_p0), %s1827_s22, 128, %s3262_s10, %s1813_s4  }
 0xc41 PF: > { %s3433_s13 = sld [smem:[#allocation23_spill]]  ;;  %s3434_s12 = sld [smem:[#allocation17_spill]] }
 0xc42   : > { %s3435_s24 = sld [smem:[#allocation29_spill]] }
 0xc47   : > { %p2330_p9 = scmp.ge.s32.totalorder %s3433_s13, 2  ;;  %s1838_s2 = sand.u32 1, %s3434_s12  }
 0xc48   : > { %p3436_p8 = scmp.ne.s32.totalorder %s3435_s24, 0  ;;  %s1839_s17 = scalar_lea.sflag [#allocation5], %s1838_s2 }
 0xc4a   : > { %p2324_p10 = pnand %p2330_p9, %p3436_p8 }
 0xc4c   : > { %2639 = dma.done.wait (!%p2324_p10), %s1839_s17, 128  }
 0xc4d   : > { %2641 = vsyncadd (!%p2324_p10), %s1839_s17, 4294967168  ;;  %s31_s23 = sadd.s32 1, %s3433_s13   ;;  %s3437_s29 = sld [smem:[#allocation15_spill]] }
 0xc4e   : > { %p28_p3 = scmp.ge.s32.totalorder %s31_s23, 6   ;;  %s3438_s30 = sld [smem:[#allocation16_spill]] }
 0xc4f   : > { %s3439_s15 = sld [smem:[#allocation26_spill]]  ;;  %s3440_s16 = sld [smem:[#allocation18_spill]] }
 0xc50   : > { %s3441_s17 = sld [smem:[#allocation19_spill]]  ;;  %s3442_s18 = sld [smem:[#allocation27_spill]] }
 0xc51   : > { %s3443_s19 = sld [smem:[#allocation21_spill]]  ;;  %s3444_s20 = sld [smem:[#allocation22_spill]] }
 0xc52   : > { %s3445_s21 = sld [smem:[#allocation24_spill]]  ;;  %s3446_s22 = sld [smem:[#allocation25_spill]] }
 0xc53   :  { %30 = sbr.rel (!%p28_p3) target bundleno = 25 (0x19), region = 179 }
 0xc5a   :  { %1844 = vsyncpa [#allocation4], 1 }
 0xc5b   :  { %1846 = vsyncpa [#allocation4 + $0x1], 1 }
 0xc5c   :  { %1847 = vsyncpa [#allocation7], 1 }
 0xc5d   :  { %1848 = vsyncpa [#allocation5], 1 }
 0xc5e   :  { %1850 = vsyncpa [#allocation5 + $0x1], 1 }

</bundles_post_ra>
